<compile_context>
chip_gen: v5e
topology: v5e:2x2
jax: 0.10.0
libtpu: 0.0.40
codegen_flags: <defaults>
</compile_context>

<pallas_src>
import jax
import jax.numpy as jnp
from jax.experimental import pallas as pl
from jax.experimental.pallas import tpu as pltpu


DP = 2  # polynomial degree (static; PKN default dp=2).  For a general static
        # integer dp, replace the single multiply with a short multiply chain.


def _pkn_kernel(x_ref, w_ref, b_ref, o_ref):
    # x_ref: (K, LT) bf16   w_ref: (O, K) bf16   b_ref: (O, 1) f32 (= bias + cp)
    # o_ref: (O, LT) f32
    lin = jnp.dot(w_ref[...], x_ref[...],
                  preferred_element_type=jnp.float32)        # MXU, f32 accumulate
    val = lin + b_ref[...]                                   # f32 VPU epilogue
    o_ref[...] = (val * val).astype(o_ref.dtype)             # dp=2 -> single vmul


def _round_up(x, m):
    return (x + m - 1) // m * m


def pkn_forward(x_unf, w, b, cp, *, max_l_tile=2048, vmem_budget=16 << 20):
    """PKN forward.

    x_unf: (B, K, L) float, K = C*kh*kw (PyTorch F.unfold channel-major layout)
    w:     (O, C, kh, kw) conv weight
    b:     (O,) conv bias
    cp:    scalar
    Returns (B, O, L) float32 — identical to the PyTorch module's output.
    """
    B, K, L = x_unf.shape
    O = w.shape[0]

    # ---- wrapper-side prep (cheap XLA glue) --------------------------------
    w_flat = w.reshape(O, K).astype(jnp.bfloat16)                    # (O, K)
    b_eff = (b.reshape(O, 1).astype(jnp.float32)
             + jnp.asarray(cp, jnp.float32))                         # bias + cp, f32
    x_bf16 = x_unf.astype(jnp.bfloat16)

    # ---- lane-dense L tiling, VMEM-budgeted (v7x-safe) ---------------------
    l_pad = _round_up(L, 128)
    # bytes per lane column: x tile (bf16, double-buffered) + out tile (f32,
    # double-buffered); weights/bias are tiny and resident.
    per_col_bytes = 2 * K * 2 + 2 * O * 4
    fit_cols = max(128, (vmem_budget // per_col_bytes) // 128 * 128)
    cap = max(128, min(max_l_tile, fit_cols, l_pad))
    l_tile = 128
    c = cap - cap % 128
    while c >= 128:
        if l_pad % c == 0:
            l_tile = c
            break
        c -= 128

    if l_pad != L:
        x_bf16 = jnp.pad(x_bf16, ((0, 0), (0, 0), (0, l_pad - L)))

    grid = (B, l_pad // l_tile)

    out_padded = pl.pallas_call(
        _pkn_kernel,
        out_shape=jax.ShapeDtypeStruct((B, O, l_pad), jnp.float32),
        grid_spec=pltpu.PrefetchScalarGridSpec(
            num_scalar_prefetch=0,
            grid=grid,
            in_specs=[
                pl.BlockSpec((None, K, l_tile), lambda bi, li: (bi, 0, li)),  # x tile
                pl.BlockSpec((O, K), lambda bi, li: (0, 0)),                  # weights (VMEM-resident)
                pl.BlockSpec((O, 1), lambda bi, li: (0, 0)),                  # bias + cp (VMEM-resident)
            ],
            out_specs=pl.BlockSpec((None, O, l_tile), lambda bi, li: (bi, 0, li)),
        ),
        compiler_params=pltpu.CompilerParams(
            dimension_semantics=("parallel", "parallel")),
    )(x_bf16, w_flat, b_eff)

    return out_padded[:, :, :L] if l_pad != L else out_padded


def unfold_nchw(x, k):
    """PyTorch F.unfold(x, kernel_size=k) equivalent (stride=1, no pad)."""
    B, C, H, W = x.shape
    Ho, Wo = H - k + 1, W - k + 1
    patches = []
    for i in range(k):
        for j in range(k):
            patches.append(x[:, :, i:i + Ho, j:j + Wo])
    p = jnp.stack(patches, axis=2)                 # (B, C, k*k, Ho, Wo)
    return p.reshape(B, C * k * k, Ho * Wo)        # channel-major flattening


if __name__ == "__main__":
    key = jax.random.PRNGKey(0)
    k_x, k_w, k_b = jax.random.split(key, 3)

    B, C, H, W = 2, 4, 16, 16
    O, kk = 8, 3

    x = jax.random.normal(k_x, (B, C, H, W), jnp.float32)
    w = jax.random.normal(k_w, (O, C, kk, kk), jnp.float32) * 0.1
    bias = jax.random.normal(k_b, (O,), jnp.float32) * 0.1
    cp = jnp.float32(1.0)   # PKN(cp=1.0, dp=2) parameter, deterministic init

    x_unf = unfold_nchw(x, kk)                     # (B, K=36, L=196)

    out = pkn_forward(x_unf, w, bias, cp)
    out = jax.block_until_ready(out)

    # Reference: same PyTorch math on the same bf16-rounded matmul inputs,
    # with exact-f32 accumulation, so only accumulation-order noise remains.
    xb = x_unf.astype(jnp.bfloat16).astype(jnp.float32)
    wb = w.reshape(O, -1).astype(jnp.bfloat16).astype(jnp.float32)
    ref_lin = jnp.einsum("ok,bkl->bol", wb, xb, precision=jax.lax.Precision.HIGHEST)
    ref = (cp + ref_lin + bias.reshape(1, O, 1)) ** DP

    assert out.shape == (B, O, (H - kk + 1) * (W - kk + 1))
    assert jnp.allclose(out, ref, atol=1e-3, rtol=1e-3), \
        float(jnp.max(jnp.abs(out - ref)))
    print("KERNEL_OK")
</pallas_src>

<mosaic_0001>
module attributes {stable_mosaic.version = 11 : i64} {
  func.func @_pkn_kernel(%arg0: i32, %arg1: i32, %arg2: memref<1x36x256xbf16, #tpu.memory_space<vmem>>, %arg3: memref<8x36xbf16, #tpu.memory_space<vmem>>, %arg4: memref<8x1xf32, #tpu.memory_space<vmem>>, %arg5: memref<1x8x256xf32, #tpu.memory_space<vmem>>) attributes {dimension_semantics = [#tpu.dimension_semantics<parallel>, #tpu.dimension_semantics<parallel>], iteration_bounds = array<i64: 2, 1>, scalar_prefetch = 0 : i64, scratch_operands = 0 : i64, tpu.core_type = #tpu.core_type<tc>, window_params = [{transform_indices = @transform_0, window_bounds = array<i64: 1, 36, 256>}, {pipeline_mode = #tpu.pipeline_mode<synchronous>, transform_indices = @transform_1, window_bounds = array<i64: 8, 36>}, {pipeline_mode = #tpu.pipeline_mode<synchronous>, transform_indices = @transform_2, window_bounds = array<i64: 8, 1>}, {transform_indices = @transform_3, window_bounds = array<i64: 1, 8, 256>}]} {
    %c0 = arith.constant 0 : index
    %c0_0 = arith.constant 0 : index
    %0 = vector.load %arg3[%c0, %c0_0] : memref<8x36xbf16, #tpu.memory_space<vmem>>, vector<8x36xbf16>
    %c0_1 = arith.constant 0 : index
    %c0_2 = arith.constant 0 : index
    %c0_3 = arith.constant 0 : index
    %1 = vector.load %arg2[%c0_1, %c0_2, %c0_3] : memref<1x36x256xbf16, #tpu.memory_space<vmem>>, vector<1x36x256xbf16>
    %2 = vector.shape_cast %1 : vector<1x36x256xbf16> to vector<36x256xbf16>
    %cst = arith.constant dense<0.000000e+00> : vector<8x256xf32>
    %3 = tpu.matmul %0, %2, %cst {dimension_numbers = #tpu.dot_dimension_numbers<[1], [0], [0], [1], [0, 0, 1, 1], [], []>} : vector<8x36xbf16>, vector<36x256xbf16>, vector<8x256xf32> -> vector<8x256xf32>
    %c0_4 = arith.constant 0 : index
    %c0_5 = arith.constant 0 : index
    %4 = vector.load %arg4[%c0_4, %c0_5] : memref<8x1xf32, #tpu.memory_space<vmem>>, vector<8x1xf32>
    %5 = vector.broadcast %4 : vector<8x1xf32> to vector<8x256xf32>
    %6 = arith.addf %3, %5 : vector<8x256xf32>
    %7 = arith.mulf %6, %6 : vector<8x256xf32>
    %c0_6 = arith.constant 0 : index
    %c0_7 = arith.constant 0 : index
    %c0_8 = arith.constant 0 : index
    %8 = vector.load %arg5[%c0_6, %c0_7, %c0_8] : memref<1x8x256xf32, #tpu.memory_space<vmem>>, vector<1x8x256xf32>
    %9 = vector.shape_cast %8 : vector<1x8x256xf32> to vector<8x256xf32>
    %10 = vector.shape_cast %7 : vector<8x256xf32> to vector<1x8x256xf32>
    tpu.vector_store %arg5[%c0_6, %c0_7, %c0_8], %10 {strides = array<i32>} : memref<1x8x256xf32, #tpu.memory_space<vmem>>, vector<1x8x256xf32>,
    return
  }
  func.func @transform_0(%arg0: i32, %arg1: i32) -> (i32, i32, i32) {
    %c0_i32 = arith.constant 0 : i32
    %c0_i32_0 = arith.constant 0 : i32
    return %arg0, %c0_i32, %arg1 : i32, i32, i32
  }
  func.func @transform_1(%arg0: i32, %arg1: i32) -> (i32, i32) {
    %c0_i32 = arith.constant 0 : i32
    %c0_i32_0 = arith.constant 0 : i32
    %c0_i32_1 = arith.constant 0 : i32
    return %c0_i32, %c0_i32_0 : i32, i32
  }
  func.func @transform_2(%arg0: i32, %arg1: i32) -> (i32, i32) {
    %c0_i32 = arith.constant 0 : i32
    %c0_i32_0 = arith.constant 0 : i32
    %c0_i32_1 = arith.constant 0 : i32
    return %c0_i32, %c0_i32_0 : i32, i32
  }
  func.func @transform_3(%arg0: i32, %arg1: i32) -> (i32, i32, i32) {
    %c0_i32 = arith.constant 0 : i32
    %c0_i32_0 = arith.constant 0 : i32
    return %arg0, %c0_i32, %arg1 : i32, i32, i32
  }
}

</mosaic_0001>

<bundles_post_ra>
// kernel: tpu_custom_call.1
= control target key start
LH: loop header
LB: loop body
LE: loop exit
PB: predicated region body
PF: predicated region fallthrough
CT: control target
= control target key end

     0   :  { %8 = vsyncpa [#allocation3], 0  ;;  %s671_s0 = inlined_call_operand.vmem [shape: bf16[2,36,256], index: 0, kind: input, shape index: {}]   ;;  %s672_s1 = inlined_call_operand.vmem [shape: bf16[8,36], index: 1, kind: input, shape index: {}]   ;;  %s673_s2 = inlined_call_operand.vmem [shape: f32[8,1], index: 2, kind: input, shape index: {}]   ;;  %s674_s3 = inlined_call_operand.hbm [shape: f32[2,8,256], index: 3, kind: output, shape index: {}]  }
   0x1   :  { %10 = vsyncpa [#allocation3 + $0x1], 0  ;;  %s568_s12 = smov 0   ;;  %s570_s13 = smov 0  }
   0x2   :  { %s572_s14 = smov 0   ;;  %s574_s15 = smov 0  }
   0x3   :  { %s576_s16 = smov 0   ;;  %s578_s17 = smov 0  }
   0x4 LB: > { %s374_s18 = sadd.s32 4294967295, %s545_s17   ;;  %s375_s19 = sadd.s32 4294967294, %s545_s17   ;;  %s545_s17 = sphi %s578_s17, %s16_s17   ;;  %s541_s16 = sphi %s576_s16, %s681_s16   ;;  %s537_s15 = sphi %s574_s15, %s680_s15   ;;  %s533_s14 = sphi %s572_s14, %s679_s14   ;;  %s529_s13 = sphi %s570_s13, %s678_s13   ;;  %s525_s12 = sphi %s568_s12, %s677_s12  }
   0x5   : > { %s28_s20 = sadd.s32 1, %s541_s16  ;;  %s107_s21 = sadd.s32 1, %s533_s14 }
   0x6   : > { %p30_p0 = scmp.ge.s32.totalorder %s28_s20, 2  ;;  %p117_p1 = scmp.ne.s32.totalorder %s533_s14, %s529_s13 }
   0x7   : > { %p118_p2 = scmp.eq.s32.totalorder %s374_s18, 1  ;;  %p123_p3 = scmp.ne.s32.totalorder %s529_s13, %s525_s12 }
   0x8   : > { %s683_s20 = smov (%p30_p0, %s28_s20), 0  ;;  %p124_p5 = scmp.eq.s32.totalorder %s375_s19, 1 }
   0x9   : > { %p608_p4 = por %p118_p2, %p117_p1  ;;  %s102_s23 = ssub.s32 %s541_s16, %s683_s20 }
   0xa   : > { %p378_p6 = scmp.ge.s32.totalorder %s545_s17, 1  ;;  %p105_p7 = scmp.eq.s32.totalorder %s102_s23, 0 }
   0xb   : > { %p615_p8 = por %p124_p5, %p123_p3  ;;  %p161_p9 = scmp.lt.s32.totalorder %s545_s17, 3 }
   0xc   : > { %s621_s25 = scalar_select %p105_p7, %s533_s14, %s107_s21  }
   0xd   : > { %p162_p10 = pnand %p378_p6, %p161_p9 }
   0xe   : > { %p190_p11 = scmp.lt.s32.totalorder (!%p162_p10), %s537_s15, 1  ;;  %s186_s8 = sand.u32 (!%p162_p10), 1, %s529_s13  }
   0xf   : > { %165 = sbr.rel (%p162_p10) target bundleno = 176 (0xb0), region = 32  ;;  %s379_s9 = sshll.u32 (!%p162_p10), %s186_s8, 4 }
  0x10   : > { %s408_s10 = sshll.u32 (!%p162_p10), %s537_s15, 4  ;;  %s188_s21 = scalar_lea.vmem (!%p162_p10), [#allocation2], %s379_s9 }
  0x11   : > { %s293_s19 = scalar_lea.hbm (!%p162_p10), %s674_s3, %s408_s10  ;;  %s295_s23 = sshll.u32 (!%p162_p10), %s188_s21, 4  ;;  %s296_s23 = int_to_ptr.vmem [resolvable:$true] %s295_s23 }
  0x12   : > { %s297_s26 = sshll.u32 (!%p162_p10), %s293_s19, 4  ;;  %s487_s4 = scalar_lea.hbm (!%p162_p10), %s674_s3, 32  ;;  %s298_s26 = int_to_ptr.hbm [resolvable:$true] %s297_s26 }
  0x13   : > { %s481_s27 = sshra.s32 (!%p162_p10), %s298_s26, 4  ;;  %s482_s27 = int_to_ptr.hbm [resolvable:$true] %s481_s27 }
  0x14   : > { %v547_v0 = vmov 0   ;;  %v207_v1 = vld [vmem:[%s673_s2] sm:$0xff]  ;;  %s191_s28 = scalar_select %p190_p11, %s537_s15, 1  ;;  %vm242_vm0 = vcmask 1041408   ;;  %vm238_vm1 = vcmask 293888  }
  0x15   : > { %466 = vset.pattern.permute.xlu0 %v547_v0  ;;  %v201_v21 = vld [vmem:[%s672_s1] sm:$0xf]  ;;  %s280_s15 = scalar_lea.sflag [#allocation3], %s186_s8  ;;  %p488_p1 = scmp.lt.s32.totalorder %s482_s27, %s674_s3 }
  0x16   : > { %210 = vperm.xlu0 %466, %v207_v1   ;;  %s409_s29 = smul.u32 40, %s191_s28  ;;  %s483_s28 = scalar_lea.hbm %s482_s27, 16 }
  0x17   : > { %p484_p12 = scmp.ne.s32.totalorder %s482_s27, %s483_s28  ;;  %p489_p2 = scmp.lt.s32.totalorder %s487_s4, %s483_s28 }
  0x18   : > { %s197_s5 = scalar_lea.vmem %s671_s0, %s409_s29 }
  0x19   : > { %v206_v2 = vld [vmem:[%s197_s5 + $0x20] sm:$0x33]  ;;  %v391_v5 = vld [vmem:[%s197_s5 + $0x10] sm:$0xf]  ;;  %v407_v8 = vld [vmem:[%s197_s5 + $0x14] sm:$0xf0]  ;;  %p485_p13 = pnand %p484_p12, %p608_p4  ;;  %p490_p3 = por %p489_p2, %p488_p1 }
  0x1a   : > { %v226_v3 = vunpack.c.l.b16 %v206_v2  ;;  %v227_v4 = vunpack.c.h.b16 %v206_v2  ;;  %v406_v9 = vld [vmem:[%s197_s5 + $0x14] sm:$0xf]  ;;  %v393_v10 = vld [vmem:[%s197_s5 + $0x18] sm:$0xf0]  ;;  %v392_v13 = vor.u32 %v407_v8, %v391_v5  ;;  %v383_v15 = vld [vmem:[%s197_s5] sm:$0xf] }
  0x1b   : > { %v396_v14 = vor.u32 %v406_v9, %v393_v10  ;;  %v405_v16 = vld [vmem:[%s197_s5 + $0x4] sm:$0xf0]  ;;  %v404_v17 = vld [vmem:[%s197_s5 + $0x4] sm:$0xf]  ;;  %v385_v18 = vld [vmem:[%s197_s5 + $0x8] sm:$0xf0]  ;;  %p486_p0 = pneg %p485_p13 }
  0x1c   : > { %v232_v6 = vpack.c.b16 %v226_v3, %v226_v3  ;;  %v233_v7 = vpack.c.b16 %v227_v4, %v227_v4  ;;  %v384_v19 = vor.u32 %v405_v16, %v383_v15  ;;  %v388_v20 = vor.u32 %v404_v17, %v385_v18 }
  0x1d   : > { %p491_p5 = pnand %p490_p3, %p486_p0 }
  0x1e   : > { %v244_v11 = vsel %vm242_vm0, %v232_v6, 0  ;;  %v247_v12 = vsel %vm242_vm0, %v233_v7, 0 }
  0x1f   : > { %254 = vmatpush.bf16.msra.mxu0 %v244_v11  ;;  %267 = vmatpush.bf16.msra.mxu1 %v247_v12 }
  0x23   : > { %255 = vmatpush.bf16.msra.mxu0 %v392_v13  ;;  %268 = vmatpush.bf16.msra.mxu1 %v396_v14 }
  0x27   : > { %256 = vmatpush.bf16.msra.mxu0 %v384_v19  ;;  %269 = vmatpush.bf16.msra.mxu1 %v388_v20 }
  0x2a   : > { %397 = vmatmul.msk.bf16.vlgmr.msra.gmra.mxu0 %vm238_vm1, %v201_v21  ;;  %398 = vmatmul.msk.bf16.vlgmr.msra.gmra.mxu1 %vm238_vm1, %v201_v21 }
  0x88   : > { %v211_v22 = vpop.permute.xlu0 %210 }
  0xa7   : > { %v258_v23 = vpop.f32.mrf.mxu0  ;;  %v271_v24 = vpop.f32.mrf.mxu1 }
  0xa8   : > { %v259_v25 = vadd.f32 %v258_v23, %v211_v22  ;;  %v272_v26 = vadd.f32 %v271_v24, %v211_v22 }
  0xaa   : > { %v275_v27 = vmul.f32 %v259_v25, %v259_v25  ;;  %v276_v28 = vmul.f32 %v272_v26, %v272_v26 }
  0xac   : > { %277 = vst [vmem:[%s188_s21] sm:$0xff] %v275_v27 }
  0xad   : > { %278 = vst [vmem:[%s188_s21 + $0x8] sm:$0xff] %v276_v28 }
  0xae   : > { %494 = shalt.err (!%p491_p5)
}
  0xaf   : > { %410 = dma.vmem_to_hbm [thread:$0]  (%p608_p4), %s296_s23, 256, %s298_s26, %s280_s15   ;;  %v260_v29 = vpop.f32.mrf.mxu0  ;;  %v273_v30 = vpop.f32.mrf.mxu1 }
  0xb0 PF: > { %p416_p6 = scmp.ge.s32.totalorder %s545_s17, 2  ;;  %s309_s7 = sand.u32 1, %s525_s12  }
  0xb1   : > { %s310_s8 = scalar_lea.sflag [#allocation3], %s309_s7 }
  0xb2   : > { %p413_p7 = pnand %p416_p6, %p615_p8 }
  0xb4   : > { %p414_p9 = pneg %p413_p7 }
  0xb6   : > { %520 = dma.done.wait (%p414_p9), %s310_s8, 256  }
  0xb7   : > { %522 = vsyncadd (%p414_p9), %s310_s8, 4294967040  ;;  %s16_s17 = sadd.s32 1, %s545_s17   ;;  %s677_s12 = smov %s529_s13 }
  0xb8   : > { %p13_p10 = scmp.ge.s32.totalorder %s16_s17, 4   ;;  %s678_s13 = smov %s533_s14 }
  0xb9   : > { %s679_s14 = smov %s621_s25  ;;  %s680_s15 = smov %s541_s16 }
  0xba   : > { %s681_s16 = smov %s683_s20  ;;  %15 = sbr.rel (!%p13_p10) target bundleno = 4 (0x4), region = 67 }
  0xbf   :  { %316 = vsyncpa [#allocation3], 1 }
  0xc0   :  { %318 = vsyncpa [#allocation3 + $0x1], 1 }

</bundles_post_ra>
